<compile_context>
chip_gen: v6e
topology: v6e:2x2x1
jax: 0.10.0
libtpu: 0.0.40
codegen_flags: <defaults>
</compile_context>

<pallas_src>
import functools

import jax
import jax.numpy as jnp
from jax.experimental import pallas as pl
from jax.experimental.pallas import tpu as pltpu

THETA = 0.5     # module default
NCORES = 2      # leading "parallel" grid axis (2 TCs on v7x; serial elsewhere)


def _cdiv(a, b):
    return -(-a // b)


def _round_up(a, b):
    return _cdiv(a, b) * b


def _loss_aux_kernel(rec_out_ref, rec_lbl_ref, cls_out_ref, cls_lbl_ref,
                     out_ref, acc_ref, *, theta, rec_n, cls_n):
    c = pl.program_id(0)            # core / half-of-rows axis ("parallel")
    i = pl.program_id(1)            # reduction-tile axis ("arbitrary")
    n_inner = pl.num_programs(1)

    tile_rows, lane = rec_out_ref.shape

    # ---- init accumulator at the start of each core's reduction loop ----------
    @pl.when(i == 0)
    def _():
        acc_ref[...] = jnp.zeros_like(acc_ref)

    # ---- hot loop: squared diff, folded into an (8, lane) accumulator ---------
    # Only element-wise VPU work here; the reshape splits the leading dim at
    # vreg-tile (8-row) boundaries so it is layout-preserving.
    diff = rec_out_ref[...].astype(jnp.float32) - rec_lbl_ref[...].astype(jnp.float32)
    sq = diff * diff
    acc_ref[...] += sq.reshape(tile_rows // 8, 8, lane).sum(axis=0)

    # ---- finalize: cross-lane reduce once, add BCE on core 0, write output ----
    @pl.when(i == n_inner - 1)
    def _():
        partial = theta * jnp.sum(acc_ref[...]) * (1.0 / float(rec_n))

        @pl.when(c == 0)
        def _():
            # numerically stable BCE with logits: max(x,0) - x*y + log1p(exp(-|x|))
            x = cls_out_ref[...].astype(jnp.float32)
            y = cls_lbl_ref[...].astype(jnp.float32)
            bce_elem = jnp.maximum(x, 0.0) - x * y + jnp.log1p(jnp.exp(-jnp.abs(x)))
            bce = jnp.sum(bce_elem) * (1.0 / float(cls_n))
            total = partial + (1.0 - theta) * bce
            out_ref[...] = jnp.full(out_ref.shape, total, dtype=out_ref.dtype)

        @pl.when(c != 0)
        def _():
            out_ref[...] = jnp.full(out_ref.shape, partial, dtype=out_ref.dtype)


def loss_aux(model_out, labels, theta=THETA):
    """JAX/Pallas equivalent of LossAux.forward.

    model_out = (cls_out, rec_out)
    labels    = (*rec_labels, cls_label)   # only the first rec label is used (MSE)
    """
    cls_out, rec_out = model_out
    *rec_labels, cls_label = labels
    rec_label = rec_labels[0]
    # TODO(synk): original LossAux forwards *all* rec labels to an injected
    # rec_loss module; we implement the standard single-target MSE variant.

    rec_n = rec_out.size
    cls_n = cls_out.size

    # Lane-dense layout: trailing dim is a multiple of 128 (prefer 512).
    lane = next((cand for cand in (512, 256, 128) if rec_n % cand == 0), 128)
    rows = _cdiv(rec_n, lane)
    # Tile rows: multiple of 8, capped so each (tile_rows x lane) f32 tile is
    # <= 1 MiB (2 inputs x 2 double-buffers = 4 MiB, well under every
    # generation's scoped VMEM limit, including v7x's 64 MiB physical / 32 MiB).
    tile_rows = min(512, _round_up(_cdiv(rows, NCORES), 8))
    n_inner = _cdiv(rows, NCORES * tile_rows)
    padded_rows = NCORES * n_inner * tile_rows

    # Keep inputs in their native dtype (bf16 stays bf16 in HBM; cast in-kernel).
    rec_out_flat = rec_out.reshape(-1)
    rec_lbl_flat = rec_label.reshape(-1)
    pad = padded_rows * lane - rec_n
    if pad:
        # Zero padding contributes 0 to the sum of squared diffs; the mean uses
        # the true rec_n, so semantics are unchanged.
        rec_out_flat = jnp.pad(rec_out_flat, (0, pad))
        rec_lbl_flat = jnp.pad(rec_lbl_flat, (0, pad))
    rec_out2 = rec_out_flat.reshape(padded_rows, lane)
    rec_lbl2 = rec_lbl_flat.reshape(padded_rows, lane)

    cls_out2 = cls_out.reshape(-1, cls_out.shape[-1])
    cls_lbl2 = cls_label.reshape(-1, cls_label.shape[-1])

    kernel = functools.partial(
        _loss_aux_kernel, theta=float(theta), rec_n=rec_n, cls_n=cls_n)

    rec_spec = pl.BlockSpec((tile_rows, lane), lambda c, i: (c * n_inner + i, 0))
    cls_o_spec = pl.BlockSpec(cls_out2.shape, lambda c, i: (0, 0))
    cls_l_spec = pl.BlockSpec(cls_lbl2.shape, lambda c, i: (0, 0))

    out = pl.pallas_call(
        kernel,
        out_shape=jax.ShapeDtypeStruct((NCORES, 8, 128), jnp.float32),
        grid_spec=pltpu.PrefetchScalarGridSpec(
            num_scalar_prefetch=0,
            grid=(NCORES, n_inner),
            in_specs=[rec_spec, rec_spec, cls_o_spec, cls_l_spec],
            out_specs=pl.BlockSpec((1, 8, 128), lambda c, i: (c, 0, 0)),
            scratch_shapes=[pltpu.VMEM((8, lane), jnp.float32)],
        ),
        compiler_params=pltpu.CompilerParams(
            dimension_semantics=("parallel", "arbitrary"),
            vmem_limit_bytes=32 * 1024 * 1024),
    )(rec_out2, rec_lbl2, cls_out2, cls_lbl2)

    # Each core's block is filled with its partial (core 0 also carries the BCE
    # term); sum the two per-core scalars.
    return jnp.sum(out[:, 0, 0])


def _loss_aux_ref(model_out, labels, theta=THETA):
    """Pure-JAX reference (mirrors the PyTorch semantics)."""
    cls_out, rec_out = model_out
    *rec_labels, cls_label = labels
    rec_label = rec_labels[0]
    mse = jnp.mean((rec_out.astype(jnp.float32) - rec_label.astype(jnp.float32)) ** 2)
    x = cls_out.astype(jnp.float32)
    y = cls_label.astype(jnp.float32)
    bce = jnp.mean(jnp.maximum(x, 0.0) - x * y + jnp.log1p(jnp.exp(-jnp.abs(x))))
    return theta * mse + (1.0 - theta) * bce


if __name__ == "__main__":
    key = jax.random.PRNGKey(0)
    k1, k2, k3, k4 = jax.random.split(key, 4)

    B, S, D = 2, 8, 32   # reconstruction output: (batch, seq, hidden)
    C = 16               # number of classification targets (multi-label logits)

    rec_out = jax.random.normal(k1, (B, S, D), dtype=jnp.float32)
    rec_label = jax.random.normal(k2, (B, S, D), dtype=jnp.float32)
    cls_out = jax.random.normal(k3, (B, C), dtype=jnp.float32)
    cls_label = jax.random.bernoulli(k4, 0.5, (B, C)).astype(jnp.float32)

    model_out = (cls_out, rec_out)
    labels = (rec_label, cls_label)

    out = loss_aux(model_out, labels)
    out = jax.block_until_ready(out)

    ref = _loss_aux_ref(model_out, labels)
    assert jnp.allclose(out, ref, atol=1e-5, rtol=1e-5), (out, ref)

    print("KERNEL_OK")
</pallas_src>

<mosaic_0001>
module attributes {stable_mosaic.version = 11 : i64} {
  func.func @_loss_aux_kernel(%arg0: i32, %arg1: i32, %arg2: memref<8x512xf32, #tpu.memory_space<vmem>>, %arg3: memref<8x512xf32, #tpu.memory_space<vmem>>, %arg4: memref<2x16xf32, #tpu.memory_space<vmem>>, %arg5: memref<2x16xf32, #tpu.memory_space<vmem>>, %arg6: memref<1x8x128xf32, #tpu.memory_space<vmem>>, %arg7: memref<8x512xf32, #tpu.memory_space<vmem>>) attributes {dimension_semantics = [#tpu.dimension_semantics<parallel>, #tpu.dimension_semantics<arbitrary>], iteration_bounds = array<i64: 2, 1>, scalar_prefetch = 0 : i64, scratch_operands = 1 : i64, tpu.core_type = #tpu.core_type<tc>, window_params = [{transform_indices = @transform_0, window_bounds = array<i64: 8, 512>}, {transform_indices = @transform_1, window_bounds = array<i64: 8, 512>}, {pipeline_mode = #tpu.pipeline_mode<synchronous>, transform_indices = @transform_2, window_bounds = array<i64: 2, 16>}, {pipeline_mode = #tpu.pipeline_mode<synchronous>, transform_indices = @transform_3, window_bounds = array<i64: 2, 16>}, {transform_indices = @transform_4, window_bounds = array<i64: 1, 8, 128>}]} {
    %c0_i32 = arith.constant 0 : i32
    %0 = arith.cmpi eq, %arg1, %c0_i32 : i32
    %1 = arith.extui %0 : i1 to i32
    %c0_i32_0 = arith.constant 0 : i32
    %2 = arith.cmpi ne, %1, %c0_i32_0 : i32
    scf.if %2 {
      %cst_10 = arith.constant 0.000000e+00 : f32
      %15 = vector.broadcast %cst_10 : f32 to vector<8x512xf32>
      %c0_11 = arith.constant 0 : index
      %c0_12 = arith.constant 0 : index
      %16 = vector.load %arg7[%c0_11, %c0_12] : memref<8x512xf32, #tpu.memory_space<vmem>>, vector<8x512xf32>
      tpu.vector_store %arg7[%c0_11, %c0_12], %15 {strides = array<i32>} : memref<8x512xf32, #tpu.memory_space<vmem>>, vector<8x512xf32>,
    } else {
    }
    %c0 = arith.constant 0 : index
    %c0_1 = arith.constant 0 : index
    %3 = vector.load %arg2[%c0, %c0_1] : memref<8x512xf32, #tpu.memory_space<vmem>>, vector<8x512xf32>
    %c0_2 = arith.constant 0 : index
    %c0_3 = arith.constant 0 : index
    %4 = vector.load %arg3[%c0_2, %c0_3] : memref<8x512xf32, #tpu.memory_space<vmem>>, vector<8x512xf32>
    %5 = arith.subf %3, %4 : vector<8x512xf32>
    %6 = arith.mulf %5, %5 : vector<8x512xf32>
    %c0_4 = arith.constant 0 : index
    %c0_5 = arith.constant 0 : index
    %7 = vector.load %arg7[%c0_4, %c0_5] : memref<8x512xf32, #tpu.memory_space<vmem>>, vector<8x512xf32>
    %8 = vector.shape_cast %6 : vector<8x512xf32> to vector<1x8x512xf32>
    %cst = arith.constant dense<0.000000e+00> : vector<8x512xf32>
    %9 = vector.multi_reduction <add>, %8, %cst [0] : vector<1x8x512xf32> to vector<8x512xf32>
    %10 = arith.addf %7, %9 : vector<8x512xf32>
    %c0_6 = arith.constant 0 : index
    %c0_7 = arith.constant 0 : index
    %11 = vector.load %arg7[%c0_6, %c0_7] : memref<8x512xf32, #tpu.memory_space<vmem>>, vector<8x512xf32>
    tpu.vector_store %arg7[%c0_6, %c0_7], %10 {strides = array<i32>} : memref<8x512xf32, #tpu.memory_space<vmem>>, vector<8x512xf32>,
    %c0_i32_8 = arith.constant 0 : i32
    %12 = arith.cmpi eq, %arg1, %c0_i32_8 : i32
    %13 = arith.extui %12 : i1 to i32
    %c0_i32_9 = arith.constant 0 : i32
    %14 = arith.cmpi ne, %13, %c0_i32_9 : i32
    scf.if %14 {
      %c0_10 = arith.constant 0 : index
      %c0_11 = arith.constant 0 : index
      %15 = vector.load %arg7[%c0_10, %c0_11] : memref<8x512xf32, #tpu.memory_space<vmem>>, vector<8x512xf32>
      %16 = vector.shape_cast %15 : vector<8x512xf32> to vector<1x8x512xf32>
      %cst_12 = arith.constant dense<0.000000e+00> : vector<1xf32>
      %17 = vector.multi_reduction <add>, %16, %cst_12 [1, 2] : vector<1x8x512xf32> to vector<1xf32>
      %18 = vector.shape_cast %17 : vector<1xf32> to vector<1x1x1xf32>
      %19 = vector.extract %18[0, 0, 0] : f32 from vector<1x1x1xf32>
      %cst_13 = arith.constant 5.000000e-01 : f32
      %20 = arith.mulf %cst_13, %19 : f32
      %cst_14 = arith.constant 0.001953125 : f32
      %21 = arith.mulf %20, %cst_14 : f32
      %c0_i32_15 = arith.constant 0 : i32
      %22 = arith.cmpi eq, %arg0, %c0_i32_15 : i32
      %23 = arith.extui %22 : i1 to i32
      %c0_i32_16 = arith.constant 0 : i32
      %24 = arith.cmpi ne, %23, %c0_i32_16 : i32
      scf.if %24 {
        %c0_19 = arith.constant 0 : index
        %c0_20 = arith.constant 0 : index
        %28 = vector.load %arg4[%c0_19, %c0_20] : memref<2x16xf32, #tpu.memory_space<vmem>>, vector<2x16xf32>
        %c0_21 = arith.constant 0 : index
        %c0_22 = arith.constant 0 : index
        %29 = vector.load %arg5[%c0_21, %c0_22] : memref<2x16xf32, #tpu.memory_space<vmem>>, vector<2x16xf32>
        %cst_23 = arith.constant 0.000000e+00 : f32
        %30 = vector.broadcast %cst_23 : f32 to vector<2x16xf32>
        %31 = arith.maximumf %28, %30 : vector<2x16xf32>
        %32 = arith.mulf %28, %29 : vector<2x16xf32>
        %33 = arith.subf %31, %32 : vector<2x16xf32>
        %34 = math.absf %28 : vector<2x16xf32>
        %cst_24 = arith.constant 0.000000e+00 : f32
        %35 = vector.broadcast %cst_24 : f32 to vector<2x16xf32>
        %36 = arith.subf %35, %34 : vector<2x16xf32>
        %37 = math.exp %36 : vector<2x16xf32>
        %38 = math.log1p %37 : vector<2x16xf32>
        %39 = arith.addf %33, %38 : vector<2x16xf32>
        %40 = vector.shape_cast %39 : vector<2x16xf32> to vector<1x2x16xf32>
        %cst_25 = arith.constant dense<0.000000e+00> : vector<1xf32>
        %41 = vector.multi_reduction <add>, %40, %cst_25 [1, 2] : vector<1x2x16xf32> to vector<1xf32>
        %42 = vector.shape_cast %41 : vector<1xf32> to vector<1x1x1xf32>
        %43 = vector.extract %42[0, 0, 0] : f32 from vector<1x1x1xf32>
        %cst_26 = arith.constant 3.125000e-02 : f32
        %44 = arith.mulf %43, %cst_26 : f32
        %cst_27 = arith.constant 5.000000e-01 : f32
        %45 = arith.mulf %cst_27, %44 : f32
        %46 = arith.addf %21, %45 : f32
        %47 = vector.broadcast %46 : f32 to vector<1x8x128xf32>
        %c0_28 = arith.constant 0 : index
        %c0_29 = arith.constant 0 : index
        %c0_30 = arith.constant 0 : index
        %48 = vector.load %arg6[%c0_28, %c0_29, %c0_30] : memref<1x8x128xf32, #tpu.memory_space<vmem>>, vector<1x8x128xf32>
        tpu.vector_store %arg6[%c0_28, %c0_29, %c0_30], %47 {strides = array<i32>} : memref<1x8x128xf32, #tpu.memory_space<vmem>>, vector<1x8x128xf32>,
      } else {
      }
      %c0_i32_17 = arith.constant 0 : i32
      %25 = arith.cmpi ne, %arg0, %c0_i32_17 : i32
      %26 = arith.extui %25 : i1 to i32
      %c0_i32_18 = arith.constant 0 : i32
      %27 = arith.cmpi ne, %26, %c0_i32_18 : i32
      scf.if %27 {
        %28 = vector.broadcast %21 : f32 to vector<1x8x128xf32>
        %c0_19 = arith.constant 0 : index
        %c0_20 = arith.constant 0 : index
        %c0_21 = arith.constant 0 : index
        %29 = vector.load %arg6[%c0_19, %c0_20, %c0_21] : memref<1x8x128xf32, #tpu.memory_space<vmem>>, vector<1x8x128xf32>
        tpu.vector_store %arg6[%c0_19, %c0_20, %c0_21], %28 {strides = array<i32>} : memref<1x8x128xf32, #tpu.memory_space<vmem>>, vector<1x8x128xf32>,
      } else {
      }
    } else {
    }
    return
  }
  func.func @transform_0(%arg0: i32, %arg1: i32) -> (i32, i32) {
    %c1_i32 = arith.constant 1 : i32
    %0 = arith.muli %arg0, %c1_i32 : i32
    %1 = arith.addi %0, %arg1 : i32
    %c0_i32 = arith.constant 0 : i32
    %c0_i32_0 = arith.constant 0 : i32
    return %1, %c0_i32 : i32, i32
  }
  func.func @transform_1(%arg0: i32, %arg1: i32) -> (i32, i32) {
    %c1_i32 = arith.constant 1 : i32
    %0 = arith.muli %arg0, %c1_i32 : i32
    %1 = arith.addi %0, %arg1 : i32
    %c0_i32 = arith.constant 0 : i32
    %c0_i32_0 = arith.constant 0 : i32
    return %1, %c0_i32 : i32, i32
  }
  func.func @transform_2(%arg0: i32, %arg1: i32) -> (i32, i32) {
    %c0_i32 = arith.constant 0 : i32
    %c0_i32_0 = arith.constant 0 : i32
    %c0_i32_1 = arith.constant 0 : i32
    return %c0_i32, %c0_i32_0 : i32, i32
  }
  func.func @transform_3(%arg0: i32, %arg1: i32) -> (i32, i32) {
    %c0_i32 = arith.constant 0 : i32
    %c0_i32_0 = arith.constant 0 : i32
    %c0_i32_1 = arith.constant 0 : i32
    return %c0_i32, %c0_i32_0 : i32, i32
  }
  func.func @transform_4(%arg0: i32, %arg1: i32) -> (i32, i32, i32) {
    %c0_i32 = arith.constant 0 : i32
    %c0_i32_0 = arith.constant 0 : i32
    %c0_i32_1 = arith.constant 0 : i32
    return %arg0, %c0_i32, %c0_i32_0 : i32, i32, i32
  }
}

</mosaic_0001>

<bundles_post_ra>
// kernel: tpu_custom_call.1
= control target key start
LH: loop header
LB: loop body
LE: loop exit
PB: predicated region body
PF: predicated region fallthrough
CT: control target
= control target key end

     0   :  { %9 = vsyncpa [#allocation4], 0  ;;  %s943_s0 = inlined_call_operand.hbm [shape: f32[16,512], index: 0, kind: input, shape index: {}]   ;;  %s944_s1 = inlined_call_operand.hbm [shape: f32[16,512], index: 1, kind: input, shape index: {}]   ;;  %s945_s2 = inlined_call_operand.vmem [shape: f32[2,16], index: 2, kind: input, shape index: {}]   ;;  %s946_s3 = inlined_call_operand.vmem [shape: f32[2,16], index: 3, kind: input, shape index: {}]   ;;  %s947_s4 = inlined_call_operand.hbm [shape: f32[2,8,128], index: 4, kind: output, shape index: {}]  }
   0x1   :  { %11 = vsyncpa [#allocation4 + $0x1], 0 }
   0x2   :  { %12 = vsyncpa [#allocation7], 0 }
   0x3   :  { %14 = vsyncpa [#allocation7 + $0x1], 0 }
   0x4   :  { %15 = vsyncpa [#allocation5], 0 }
   0x5   :  { %17 = vsyncpa [#allocation5 + $0x1], 0  ;;  %s762_s15 = smov 0   ;;  %s764_s16 = smov 0  }
   0x6   :  { %s766_s17 = smov 0   ;;  %s768_s18 = smov 0  }
   0x7   :  { %s770_s19 = smov 0   ;;  %s772_s20 = smov 0  }
   0x8 LB: > { %s495_s21 = sadd.s32 4294967295, %s732_s20   ;;  %s496_s22 = sadd.s32 4294967294, %s732_s20   ;;  %s732_s20 = sphi %s772_s20, %s23_s20   ;;  %s728_s19 = sphi %s770_s19, %s959_s19   ;;  %s724_s18 = sphi %s768_s18, %s958_s18   ;;  %s720_s17 = sphi %s766_s17, %s957_s17   ;;  %s716_s16 = sphi %s764_s16, %s956_s16   ;;  %s712_s15 = sphi %s762_s15, %s955_s15  }
   0x9   : > { %s35_s23 = sadd.s32 1, %s728_s19  ;;  %s44_s24 = sadd.s32 1, %s720_s17 }
   0xa   : > { %p37_p0 = scmp.ge.s32.totalorder %s35_s23, 2  ;;  %p51_p1 = scmp.ne.s32.totalorder %s720_s17, %s716_s16 }
   0xb   : > { %p52_p2 = scmp.eq.s32.totalorder %s732_s20, 0  ;;  %p57_p3 = scmp.ne.s32.totalorder %s716_s16, %s712_s15 }
   0xc   : > { %s961_s23 = smov (%p37_p0, %s35_s23), 0  ;;  %p58_p5 = scmp.eq.s32.totalorder %s495_s21, 0 }
   0xd   : > { %p803_p4 = por %p52_p2, %p51_p1  ;;  %s41_s26 = ssub.s32 %s728_s19, %s961_s23 }
   0xe   : > { %p151_p6 = scmp.eq.s32.totalorder %s495_s21, 1  ;;  %p42_p7 = scmp.eq.s32.totalorder %s41_s26, 0 }
   0xf   : > { %p809_p8 = por %p58_p5, %p57_p3  ;;  %p157_p10 = scmp.eq.s32.totalorder %s496_s22, 1 }
  0x10   : > { %p813_p9 = por %p151_p6, %p51_p1  ;;  %p538_p13 = scmp.lt.s32.totalorder %s732_s20, 2 }
  0x11   : > { %s818_s29 = scalar_select %p42_p7, %s720_s17, %s44_s24  }
  0x12   : > { %p820_p11 = por %p157_p10, %p57_p3  ;;  %s827_s5 = sand.u32 1, %s720_s17  }
  0x13   : > { %s499_s6 = sshll.u32 %s827_s5, 5  ;;  %s515_s7 = sshll.u32 %s728_s19, 9 }
  0x14   : > { %s194_s10 = scalar_lea.hbm %s943_s0, %s515_s7  ;;  %s187_s11 = scalar_lea.vmem [#allocation3], %s499_s6 }
  0x15   : > { %s196_s12 = sshll.u32 %s187_s11, 4  ;;  %p836_p0 = pnand %p538_p13, %p803_p4  ;;  %s197_s12 = int_to_ptr.vmem [resolvable:$true] %s196_s12 }
  0x16   : > { %p505_p1 = scmp.ge.s32.totalorder %s732_s20, 1  ;;  %p221_p2 = scmp.lt.s32.totalorder %s732_s20, 3 }
  0x17   : > { %s184_s14 = scalar_lea.sflag [#allocation4], %s827_s5  ;;  %p594_p3 = pneg %p836_p0 }
  0x18   : > { %s605_s21 = scalar_lea.vmem %s197_s12, 512  ;;  %s734_s22 = smov [#allocation3]  }
  0x19   : > { %p606_p5 = scmp.ne.s32.totalorder %s197_s12, %s605_s21  ;;  %s610_s24 = sshll.u32 %s734_s22, 4  ;;  %s611_s24 = int_to_ptr.vmem [resolvable:$false] %s610_s24 }
  0x1a   : > { %s612_s25 = scalar_lea.vmem %s611_s24, 1024  ;;  %p613_p4 = scmp.lt.s32.totalorder %s197_s12, %s611_s24 }
  0x1b   : > { %p608_p6 = pnand %p606_p5, %p594_p3  ;;  %p614_p10 = scmp.lt.s32.totalorder %s612_s25, %s605_s21 }
  0x1d   : > { %p609_p7 = pneg %p608_p6  ;;  %p615_p13 = por %p614_p10, %p613_p4 }
  0x1f   : > { %p616_p12 = pnand %p615_p13, %p609_p7 }
  0x21   : > { %619 = shalt.err (!%p616_p12)
}
  0x22   : > { %530 = dma.hbm_to_vmem [thread:$0]  (!%p836_p0), %s194_s10, 512, %s197_s12, %s184_s14  }
  0x23   : > { %p854_p5 = pnand %p505_p1, %p221_p2  ;;  %s214_s11 = scalar_lea.hbm %s944_s1, %s515_s7 }
  0x24   : > { %s207_s21 = scalar_lea.vmem [#allocation6], %s499_s6  ;;  %s204_s24 = scalar_lea.sflag [#allocation7], %s827_s5 }
  0x25   : > { %s216_s22 = sshll.u32 %s207_s21, 4  ;;  %s735_s10 = smov [#allocation6]   ;;  %s217_s22 = int_to_ptr.vmem [resolvable:$true] %s216_s22 }
  0x26   : > { %s633_s25 = scalar_lea.vmem %s217_s22, 512  ;;  %s638_s12 = sshll.u32 %s735_s10, 4  ;;  %s639_s12 = int_to_ptr.vmem [resolvable:$false] %s638_s12 }
  0x27   : > { %p634_p12 = scmp.ne.s32.totalorder %s217_s22, %s633_s25  ;;  %s640_s14 = scalar_lea.vmem %s639_s12, 1024 }
  0x28   : > { %p641_p1 = scmp.lt.s32.totalorder %s217_s22, %s639_s12  ;;  %p642_p2 = scmp.lt.s32.totalorder %s640_s14, %s633_s25 }
  0x29   : > { %p636_p6 = pnand %p634_p12, %p594_p3 }
  0x2a   : > { %p643_p4 = por %p642_p2, %p641_p1 }
  0x2b   : > { %p637_p7 = pneg %p636_p6 }
  0x2d   : > { %p644_p10 = pnand %p643_p4, %p637_p7 }
  0x2f   : > { %647 = shalt.err (!%p644_p10)
}
  0x30   : > { %533 = dma.hbm_to_vmem [thread:$0]  (!%p836_p0), %s214_s11, 512, %s217_s22, %s204_s24  }
  0x31   : > { %225 = sbr.rel (%p854_p5) target bundleno = 556 (0x22c), region = 36  ;;  %s870_s5 = sand.u32 (!%p854_p5), 1, %s716_s16  }
  0x32   : > { %s506_s6 = sshll.u32 (!%p854_p5), %s870_s5, 5  ;;  %s228_s7 = scalar_lea.sflag (!%p854_p5), [#allocation4], %s870_s5 }
  0x33   : > { %s231_s8 = scalar_lea.vmem (!%p854_p5), [#allocation3], %s506_s6 }
  0x36   : > { %699 = dma.done.wait (%p809_p8), %s228_s7, 512  }
  0x37   : > { %701 = vsyncadd (%p809_p8), %s228_s7, 4294966784  ;;  %s237_s13 = scalar_lea.sflag [#allocation7], %s870_s5  ;;  %s240_s9 = scalar_lea.vmem [#allocation6], %s506_s6 }
  0x38   : > { %703 = dma.done.wait (%p809_p8), %s237_s13, 512  }
  0x39   : > { %705 = vsyncadd (%p809_p8), %s237_s13, 4294966784  ;;  %s508_s26 = sshll.u32 %s870_s5, 3  ;;  %v280_v0 = vld [vmem:[%s231_s8] sm:$0xff]  ;;  %v281_v1 = vld [vmem:[%s231_s8 + $0x8] sm:$0xff]  ;;  %p509_p8 = scmp.ne.s32.totalorder %s724_s18, 0 }
  0x3a   : > { %v282_v2 = vld [vmem:[%s231_s8 + $0x10] sm:$0xff]  ;;  %v283_v3 = vld [vmem:[%s231_s8 + $0x18] sm:$0xff]  ;;  %v284_v4 = vld [vmem:[%s240_s9] sm:$0xff]  ;;  %s888_s22 = scalar_lea.vmem [#allocation8], %s508_s26 }
  0x3b   : > { %v285_v5 = vld [vmem:[%s240_s9 + $0x8] sm:$0xff]  ;;  %v286_v6 = vld [vmem:[%s240_s9 + $0x10] sm:$0xff]  ;;  %v287_v7 = vld [vmem:[%s240_s9 + $0x18] sm:$0xff]  ;;  %v288_v8 = vsub.f32 %v280_v0, %v284_v4 }
  0x3c   : > { %v289_v9 = vsub.f32 %v281_v1, %v285_v5  ;;  %v290_v10 = vsub.f32 %v282_v2, %v286_v6  ;;  %v291_v11 = vsub.f32 %v283_v3, %v287_v7 }
  0x3d   : > { %v292_v12 = vmul.f32 %v288_v8, %v288_v8 }
  0x3e   : > { %v293_v13 = vmul.f32 %v289_v9, %v289_v9  ;;  %v294_v14 = vmul.f32 %v290_v10, %v290_v10  ;;  %v295_v15 = vmul.f32 %v291_v11, %v291_v11 }
  0x40   : > { %v319_v16 = vadd.f32 %v293_v13, %v292_v12 }
  0x42   : > { %v320_v17 = vadd.f32 %v319_v16, %v294_v14 }
  0x44   : > { %v321_v18 = vadd.f32 %v320_v17, %v295_v15 }
  0x46   : > { %322 = vadd.xlane.f32.xlu0 %v321_v18 }
  0xcf   : > { %v323_v19 = vpop.xlane.xlu0 %322 }
  0xd0   : > { %v324_v20 = vrot.slane %v323_v19, 4 }
  0xd2   : > { %v325_v21 = vadd.f32 %v324_v20, %v323_v19 }
  0xd4   : > { %v326_v22 = vrot.slane %v325_v21, 2 }
  0xd6   : > { %v327_v23 = vadd.f32 %v326_v22, %v325_v21 }
  0xd8   : > { %v328_v24 = vrot.slane %v327_v23, 1 }
  0xda   : > { %v329_v25 = vadd.f32 %v328_v24, %v327_v23 }
  0xdc   : > { %517 = vpush %v329_v25 }
 0x10c   : > { %336 = sbr.rel (%p509_p8) target bundleno = 524 (0x20c), region = 56 }
 0x10d   : > { %s518_s27 = spop %517 }
 0x10e   : > { %s331_s11 = smul.f32 0.5, %s518_s27 }
 0x110   : > { %s884_s21 = smul.f32 0.001953125, %s331_s11 }
 0x111   : > { %v337_v26 = vld [vmem:[%s945_s2] sm:$0x3]  ;;  %vm356_vm1 = vcmask 123904  }
 0x112   : > { %v342_v27 = vand.u32 2147483647, %v337_v26  ;;  %v338_v33 = vld [vmem:[%s946_s3] sm:$0x3]  ;;  %v339_v35 = vmax.f32 %v337_v26, 0.0 }
 0x113   : > { %v340_v36 = vmul.f32 %v338_v33, %v337_v26 }
 0x114   : > { %v343_v28 = vsub.f32 0.0, %v342_v27 }
 0x115   : > { %v341_v40 = vsub.f32 %v339_v35, %v340_v36 }
 0x116   : > { %v344_v29 = vmul.f32 1.442695, %v343_v28 }
 0x118   : > { %588 = vpow2.f32 %v344_v29 }
 0x125   : > { %v589_v30 = vpop.eup %588 }
 0x126   : > { %v346_v31 = vadd.f32 1.0, %v589_v30  ;;  %v349_v32 = vmul.f32 -0.5, %v589_v30  ;;  %v352_v37 = vand.u32 2147483647, %v589_v30 }
 0x128   : > { %590 = vlog2.f32 %v346_v31  ;;  %v350_v34 = vadd.f32 1.0, %v349_v32  ;;  %vm353_vm0 = vcmp.lt.f32.partialorder %v352_v37, 0.0004427343 }
 0x12a   : > { %v351_v38 = vmul.f32 %v589_v30, %v350_v34 }
 0x135   : > { %v591_v39 = vpop.eup %590 }
 0x136   : > { %v348_v41 = vmul.f32 0.6931472, %v591_v39 }
 0x138   : > { %v354_v42 = vsel %vm353_vm0, %v351_v38, %v348_v41 }
 0x139   : > { %v355_v43 = vadd.f32 %v354_v42, %v341_v40 }
 0x13b   : > { %v357_v44 = vsel %vm356_vm1, %v355_v43, 0.0 }
 0x13c   : > { %358 = vadd.xlane.f32.xlu0 %v357_v44 }
 0x1c5   : > { %v359_v45 = vpop.xlane.xlu0 %358 }
 0x1c6   : > { %v360_v46 = vrot.slane %v359_v45, 4 }
 0x1c8   : > { %v361_v47 = vadd.f32 %v360_v46, %v359_v45 }
 0x1ca   : > { %v362_v48 = vrot.slane %v361_v47, 2 }
 0x1cc   : > { %v363_v49 = vadd.f32 %v362_v48, %v361_v47 }
 0x1ce   : > { %v364_v50 = vrot.slane %v363_v49, 1 }
 0x1d0   : > { %v365_v51 = vadd.f32 %v364_v50, %v363_v49 }
 0x1d2   : > { %519 = vpush %v365_v51 }
 0x203   : > { %s520_s14 = spop %519 }
 0x204   : > { %s367_s6 = smul.f32 0.03125, %s520_s14 }
 0x206   : > { %s368_s7 = smul.f32 0.5, %s367_s6 }
 0x208   : > { %s369_s8 = sadd.f32 %s368_s7, %s884_s21 }
 0x20a   : > { %v370_v52 = vstv %s369_s8 }
 0x20b   : > { %371 = vst [vmem:[%s888_s22] sm:$0xff] %v370_v52 }
 0x20c PF: > { %p510_p0 = scmp.eq.s32.totalorder %s724_s18, 0 }
 0x20e   : > { %375 = sbr.rel (%p510_p0) target bundleno = 533 (0x215), region = 60 }
 0x213   : > { %v376_v53 = vstv %s884_s21 }
 0x214   : > { %377 = vst [vmem:[%s888_s22] sm:$0xff] %v376_v53 }
 0x215 PF: > { %s512_s13 = sshll.u32 %s724_s18, 7  ;;  %s392_s11 = sshll.u32 %s888_s22, 4  ;;  %s393_s11 = int_to_ptr.vmem [resolvable:$true] %s392_s11 }
 0x216   : > { %s390_s27 = scalar_lea.hbm %s947_s4, %s512_s13  ;;  %s379_s24 = scalar_lea.sflag [#allocation5], %s870_s5 }
 0x217   : > { %s648_s25 = scalar_lea.vmem %s393_s11, 128  ;;  %s736_s21 = smov [#allocation8]  }
 0x218   : > { %p649_p3 = scmp.ne.s32.totalorder %s393_s11, %s648_s25  ;;  %s652_s10 = sshll.u32 %s736_s21, 4  ;;  %s653_s10 = int_to_ptr.vmem [resolvable:$false] %s652_s10 }
 0x219   : > { %s654_s12 = scalar_lea.vmem %s653_s10, 256  ;;  %p655_p12 = scmp.lt.s32.totalorder %s393_s11, %s653_s10 }
 0x21a   : > { %p650_p13 = pnand %p649_p3, %p813_p9  ;;  %p656_p6 = scmp.lt.s32.totalorder %s654_s12, %s648_s25 }
 0x21c   : > { %p651_p5 = pneg %p650_p13  ;;  %p657_p7 = por %p656_p6, %p655_p12 }
 0x21e   : > { %p658_p1 = pnand %p657_p7, %p651_p5 }
 0x220   : > { %661 = shalt.err (!%p658_p1)
}
 0x221   : > { %s662_s18 = scalar_lea.hbm %s390_s27, 128  ;;  %s666_s14 = scalar_lea.hbm %s947_s4, 256 }
 0x222   : > { %p663_p2 = scmp.ne.s32.totalorder %s390_s27, %s662_s18  ;;  %p667_p8 = scmp.lt.s32.totalorder %s390_s27, %s947_s4 }
 0x223   : > { %p668_p0 = scmp.lt.s32.totalorder %s666_s14, %s662_s18 }
 0x224   : > { %p664_p4 = pnand %p663_p2, %p813_p9 }
 0x225   : > { %p669_p3 = por %p668_p0, %p667_p8 }
 0x226   : > { %p665_p10 = pneg %p664_p4 }
 0x228   : > { %p670_p13 = pnand %p669_p3, %p665_p10 }
 0x22a   : > { %673 = shalt.err (!%p670_p13)
}
 0x22b   : > { %525 = dma.vmem_to_hbm [thread:$0]  (%p813_p9), %s393_s11, 128, %s390_s27, %s379_s24  }
 0x22c PF: > { %s404_s8 = sand.u32 1, %s712_s15   ;;  %p954_p5 = scmp.ge.s32.totalorder %s732_s20, 2 }
 0x22d   : > { %s405_s13 = scalar_lea.sflag [#allocation5], %s404_s8 }
 0x22e   : > { %p535_p12 = pnand %p954_p5, %p820_p11 }
 0x230   : > { %p536_p6 = pneg %p535_p12 }
 0x232   : > { %707 = dma.done.wait (%p536_p6), %s405_s13, 128  }
 0x233   : > { %709 = vsyncadd (%p536_p6), %s405_s13, 4294967168  ;;  %s23_s20 = sadd.s32 1, %s732_s20   ;;  %s955_s15 = smov %s716_s16 }
 0x234   : > { %p20_p7 = scmp.ge.s32.totalorder %s23_s20, 4   ;;  %s956_s16 = smov %s720_s17 }
 0x235   : > { %s957_s17 = smov %s818_s29  ;;  %s958_s18 = smov %s728_s19 }
 0x236   : > { %s959_s19 = smov %s961_s23  ;;  %22 = sbr.rel (!%p20_p7) target bundleno = 8 (0x8), region = 110 }
 0x23b   :  { %410 = vsyncpa [#allocation4], 1 }
 0x23c   :  { %412 = vsyncpa [#allocation4 + $0x1], 1 }
 0x23d   :  { %413 = vsyncpa [#allocation7], 1 }
 0x23e   :  { %415 = vsyncpa [#allocation7 + $0x1], 1 }
 0x23f   :  { %416 = vsyncpa [#allocation5], 1 }
 0x240   :  { %418 = vsyncpa [#allocation5 + $0x1], 1 }

</bundles_post_ra>
